<compile_context>
chip_gen: v7x
topology: tpu7x:2x2x1
jax: 0.10.0
libtpu: 0.0.40
codegen_flags: <defaults>
</compile_context>

<pallas_src>
import functools

import jax
import jax.numpy as jnp
from jax import lax
from jax.experimental import pallas as pl
from jax.experimental.pallas import tpu as pltpu


def _round_up(x: int, m: int) -> int:
    return (x + m - 1) // m * m


def _vmem_limit_bytes() -> int:
    """Generation-aware scoped-VMEM request.

    v5e/v6e: 128 MiB physical VMEM -> request 64 MiB.
    v7x:      64 MiB per TensorCore -> stay at 32 MiB.
    Falls back to the most conservative (v7x) value if the query fails.
    """
    try:
        phys = int(getattr(pltpu.get_tpu_info(), "vmem_capacity_bytes", 0))
    except Exception:
        phys = 0
    if phys <= 0:
        phys = 64 * 1024 * 1024
    return min(phys // 2, 64 * 1024 * 1024)


def gated_attention_kernel(h_ref, wc_ref, bc_ref, w2_ref, b2_ref, o_ref, *,
                           n_latent: int):
    # h tile in its native dtype; accumulate in f32 on the MXU.
    h = h_ref[...]                                                    # (TN, n_in)
    zc = jnp.dot(h, wc_ref[...],
                 preferred_element_type=jnp.float32) + bc_ref[...]    # (TN, 2L) f32

    a = jnp.tanh(zc[:, :n_latent])                                    # EUP
    g = jax.nn.sigmoid(zc[:, n_latent:])                              # EUP
    z = a * g                                                         # (TN, L) f32

    # Final per-row score computed as w2 @ z^T (contract both minor dims), so
    # the result is a lane-dense (1, TN) row: wide unmasked stores, no width-1
    # MXU output column and no masked vst epilogue.
    score = lax.dot_general(
        w2_ref[...].astype(jnp.float32), z,
        dimension_numbers=(((1,), (1,)), ((), ())),
        preferred_element_type=jnp.float32) + b2_ref[...]             # (1, TN)

    o_ref[...] = score.astype(o_ref.dtype)


def fuse_gated_attention_params(w1, b1, wg, bg, w2, b2, *, dtype):
    """One-time weight fusion.  Hoist this out of the hot path when the weights
    are static across calls (review item: avoids a small per-call XLA concat)."""
    n_in, n_latent = w1.shape
    wc = jnp.concatenate([w1, wg], axis=1).astype(dtype)              # (n_in, 2L)
    bc = jnp.concatenate([jnp.reshape(b1, (1, n_latent)),
                          jnp.reshape(bg, (1, n_latent))],
                         axis=1).astype(jnp.float32)                  # (1, 2L)
    w2_row = jnp.reshape(w2, (1, n_latent))                           # (1, L)
    b2_sc = jnp.reshape(b2, (1, 1)).astype(jnp.float32)               # (1, 1)
    return wc, bc, w2_row, b2_sc


def gated_attention_fused(h, wc, bc, w2_row, b2_sc, *, tile_rows=None):
    """Pallas GatedAttention forward on pre-fused weights.  Returns (N, 1)."""
    n, n_in = h.shape
    two_latent = wc.shape[1]
    n_latent = two_latent // 2
    itemsize = jnp.dtype(h.dtype).itemsize

    vmem_limit = _vmem_limit_bytes()

    if tile_rows is None:
        # Per-row VMEM footprint: double-buffered h tile + ~3 live f32
        # intermediates of width 2L (zc, a/g, z) + the output lane.
        per_row_bytes = 2 * n_in * itemsize + 3 * 4 * two_latent + 8
        tn = (vmem_limit // 2) // max(1, per_row_bytes)
        tn = max(128, min(16384, (tn // 128) * 128))
        # Never allocate a tile (much) larger than the data.
        tn = min(tn, _round_up(n, 128))
        # v7x megacore: keep >= 2 row tiles so both TensorCores get work.
        if n >= 256:
            tn = min(tn, _round_up(pl.cdiv(n, 2), 128))
        tn = max(tn, 128)
    else:
        tn = int(tile_rows)
        assert tn % 128 == 0, "tile_rows must be a multiple of 128"
    num_tiles = pl.cdiv(n, tn)

    cost = pl.CostEstimate(
        flops=2 * n * n_in * two_latent + 5 * n * n_latent + 2 * n * n_latent,
        transcendentals=2 * n * n_latent,
        bytes_accessed=itemsize * (n * n_in + n_in * two_latent + n)
        + 4 * (two_latent + n_latent + 1),
    )

    out_row = pl.pallas_call(
        functools.partial(gated_attention_kernel, n_latent=n_latent),
        out_shape=jax.ShapeDtypeStruct((1, n), h.dtype),              # lane-dense scores
        grid=(num_tiles,),
        in_specs=[
            pl.BlockSpec((tn, n_in), lambda i: (i, 0)),               # h tile (pipelined, ragged tail overruns)
            pl.BlockSpec((n_in, two_latent), lambda i: (0, 0)),       # fused W1||Wg (VMEM-resident)
            pl.BlockSpec((1, two_latent), lambda i: (0, 0)),          # fused bias
            pl.BlockSpec((1, n_latent), lambda i: (0, 0)),            # w2 row
            pl.BlockSpec((1, 1), lambda i: (0, 0)),                   # b2
        ],
        out_specs=pl.BlockSpec((1, tn), lambda i: (0, i)),
        compiler_params=pltpu.CompilerParams(
            dimension_semantics=("parallel",),   # shards rows across TCs on v7x
            vmem_limit_bytes=vmem_limit,
        ),
        cost_estimate=cost,
    )(h, wc, bc, w2_row, b2_sc)

    # (1, N) lane-dense scores -> (N, 1).
    return jnp.reshape(out_row, (n, 1))


def gated_attention(h, w1, b1, wg, bg, w2, b2, *, tile_rows=None):
    """Pallas equivalent of GatedAttention.forward.

    h: (N, n_in); w1/wg: (n_in, n_latent); b1/bg: (1, n_latent); w2: (n_latent, 1);
    b2: (1, 1).  Returns (N, 1).
    """
    params = fuse_gated_attention_params(w1, b1, wg, bg, w2, b2, dtype=h.dtype)
    return gated_attention_fused(h, *params, tile_rows=tile_rows)


def init_linear_params(key, n_in, n_out, dtype=jnp.float32):
    # Deterministic init mimicking nn.Linear's U(-1/sqrt(fan_in), +1/sqrt(fan_in)).
    kw, kb = jax.random.split(key)
    bound = 1.0 / jnp.sqrt(jnp.asarray(n_in, dtype))
    w = jax.random.uniform(kw, (n_in, n_out), dtype, minval=-bound, maxval=bound)
    b = jax.random.uniform(kb, (1, n_out), dtype, minval=-bound, maxval=bound)
    return w, b


def reference(h, w1, b1, wg, bg, w2, b2):
    a = jnp.tanh(h @ w1 + b1)
    g = jax.nn.sigmoid(h @ wg + bg)
    return (a * g) @ w2 + b2


if __name__ == "__main__":
    # Small shapes consistent with the module: a "bag" of N=8 instances,
    # each with n_in=32 features; n_latent = (n_in + 1) // 2 = 16.
    N, n_in = 8, 32
    n_latent = (n_in + 1) // 2

    key = jax.random.PRNGKey(0)
    k_h, k1, k2, k3, k_h2 = jax.random.split(key, 5)

    h = jax.random.normal(k_h, (N, n_in), jnp.float32)
    w1, b1 = init_linear_params(k1, n_in, n_latent)
    wg, bg = init_linear_params(k2, n_in, n_latent)
    w2, b2 = init_linear_params(k3, n_latent, 1)

    out = jax.block_until_ready(gated_attention(h, w1, b1, wg, bg, w2, b2))
    ref = reference(h, w1, b1, wg, bg, w2, b2)
    assert out.shape == (N, 1), out.shape
    assert jnp.allclose(out, ref, atol=1e-5, rtol=1e-5), (out, ref)

    # Exercise the gridded, ragged, no-pad path (3 tiles, last block overruns).
    N2 = 300
    h2 = jax.random.normal(k_h2, (N2, n_in), jnp.float32)
    out2 = jax.block_until_ready(
        gated_attention(h2, w1, b1, wg, bg, w2, b2, tile_rows=128))
    ref2 = reference(h2, w1, b1, wg, bg, w2, b2)
    assert out2.shape == (N2, 1), out2.shape
    assert jnp.allclose(out2, ref2, atol=1e-5, rtol=1e-5)

    # Auto tile-size path on a ragged mid-size N (megacore gets >= 2 tiles).
    out3 = jax.block_until_ready(gated_attention(h2, w1, b1, wg, bg, w2, b2))
    assert out3.shape == (N2, 1), out3.shape
    assert jnp.allclose(out3, ref2, atol=1e-5, rtol=1e-5)

    print("KERNEL_OK")
</pallas_src>

<mosaic_0001>
module attributes {stable_mosaic.version = 11 : i64} {
  func.func @gated_attention_kernel(%arg0: i32, %arg1: memref<128x32xf32, #tpu.memory_space<vmem>>, %arg2: memref<32x32xf32, #tpu.memory_space<vmem>>, %arg3: memref<1x32xf32, #tpu.memory_space<vmem>>, %arg4: memref<1x16xf32, #tpu.memory_space<vmem>>, %arg5: memref<1x1xf32, #tpu.memory_space<vmem>>, %arg6: memref<1x128xf32, #tpu.memory_space<vmem>>) attributes {dimension_semantics = [#tpu.dimension_semantics<parallel>], iteration_bounds = array<i64: 1>, scalar_prefetch = 0 : i64, scratch_operands = 0 : i64, tpu.core_type = #tpu.core_type<tc>, window_params = [{transform_indices = @transform_0, window_bounds = array<i64: 128, 32>}, {pipeline_mode = #tpu.pipeline_mode<synchronous>, transform_indices = @transform_1, window_bounds = array<i64: 32, 32>}, {pipeline_mode = #tpu.pipeline_mode<synchronous>, transform_indices = @transform_2, window_bounds = array<i64: 1, 32>}, {pipeline_mode = #tpu.pipeline_mode<synchronous>, transform_indices = @transform_3, window_bounds = array<i64: 1, 16>}, {pipeline_mode = #tpu.pipeline_mode<synchronous>, transform_indices = @transform_4, window_bounds = array<i64: 1, 1>}, {transform_indices = @transform_5, window_bounds = array<i64: 1, 128>}]} {
    %c0 = arith.constant 0 : index
    %c0_0 = arith.constant 0 : index
    %0 = vector.load %arg1[%c0, %c0_0] : memref<128x32xf32, #tpu.memory_space<vmem>>, vector<128x32xf32>
    %c0_1 = arith.constant 0 : index
    %c0_2 = arith.constant 0 : index
    %1 = vector.load %arg2[%c0_1, %c0_2] : memref<32x32xf32, #tpu.memory_space<vmem>>, vector<32x32xf32>
    %cst = arith.constant dense<0.000000e+00> : vector<128x32xf32>
    %2 = tpu.matmul %0, %1, %cst {dimension_numbers = #tpu.dot_dimension_numbers<[1], [0], [0], [1], [0, 0, 1, 1], [], []>} : vector<128x32xf32>, vector<32x32xf32>, vector<128x32xf32> -> vector<128x32xf32>
    %c0_3 = arith.constant 0 : index
    %c0_4 = arith.constant 0 : index
    %3 = vector.load %arg3[%c0_3, %c0_4] : memref<1x32xf32, #tpu.memory_space<vmem>>, vector<1x32xf32>
    %4 = vector.broadcast %3 : vector<1x32xf32> to vector<128x32xf32>
    %5 = arith.addf %2, %4 : vector<128x32xf32>
    %6 = vector.extract_strided_slice %5 {offsets = [0, 0], sizes = [128, 16], strides = [1, 1]} : vector<128x32xf32> to vector<128x16xf32>
    %7 = math.tanh %6 : vector<128x16xf32>
    %8 = vector.extract_strided_slice %5 {offsets = [0, 16], sizes = [128, 16], strides = [1, 1]} : vector<128x32xf32> to vector<128x16xf32>
    %9 = arith.negf %8 : vector<128x16xf32>
    %10 = math.exp %9 : vector<128x16xf32>
    %cst_5 = arith.constant 1.000000e+00 : f32
    %11 = vector.broadcast %cst_5 : f32 to vector<128x16xf32>
    %12 = arith.addf %11, %10 : vector<128x16xf32>
    %13 = arith.divf %11, %12 : vector<128x16xf32>
    %14 = arith.mulf %7, %13 : vector<128x16xf32>
    %c0_6 = arith.constant 0 : index
    %c0_7 = arith.constant 0 : index
    %15 = vector.load %arg4[%c0_6, %c0_7] : memref<1x16xf32, #tpu.memory_space<vmem>>, vector<1x16xf32>
    %cst_8 = arith.constant dense<0.000000e+00> : vector<1x128xf32>
    %16 = tpu.matmul %15, %14, %cst_8 {dimension_numbers = #tpu.dot_dimension_numbers<[1], [1], [0], [0], [0, 0, 1, 0], [], []>} : vector<1x16xf32>, vector<128x16xf32>, vector<1x128xf32> -> vector<1x128xf32>
    %c0_9 = arith.constant 0 : index
    %c0_10 = arith.constant 0 : index
    %17 = vector.load %arg5[%c0_9, %c0_10] : memref<1x1xf32, #tpu.memory_space<vmem>>, vector<1x1xf32>
    %18 = vector.broadcast %17 : vector<1x1xf32> to vector<1x128xf32>
    %19 = arith.addf %16, %18 : vector<1x128xf32>
    %c0_11 = arith.constant 0 : index
    %c0_12 = arith.constant 0 : index
    %20 = vector.load %arg6[%c0_11, %c0_12] : memref<1x128xf32, #tpu.memory_space<vmem>>, vector<1x128xf32>
    tpu.vector_store %arg6[%c0_11, %c0_12], %19 {strides = array<i32>} : memref<1x128xf32, #tpu.memory_space<vmem>>, vector<1x128xf32>,
    return
  }
  func.func @transform_0(%arg0: i32) -> (i32, i32) {
    %c0_i32 = arith.constant 0 : i32
    %c0_i32_0 = arith.constant 0 : i32
    return %arg0, %c0_i32 : i32, i32
  }
  func.func @transform_1(%arg0: i32) -> (i32, i32) {
    %c0_i32 = arith.constant 0 : i32
    %c0_i32_0 = arith.constant 0 : i32
    %c0_i32_1 = arith.constant 0 : i32
    return %c0_i32, %c0_i32_0 : i32, i32
  }
  func.func @transform_2(%arg0: i32) -> (i32, i32) {
    %c0_i32 = arith.constant 0 : i32
    %c0_i32_0 = arith.constant 0 : i32
    %c0_i32_1 = arith.constant 0 : i32
    return %c0_i32, %c0_i32_0 : i32, i32
  }
  func.func @transform_3(%arg0: i32) -> (i32, i32) {
    %c0_i32 = arith.constant 0 : i32
    %c0_i32_0 = arith.constant 0 : i32
    %c0_i32_1 = arith.constant 0 : i32
    return %c0_i32, %c0_i32_0 : i32, i32
  }
  func.func @transform_4(%arg0: i32) -> (i32, i32) {
    %c0_i32 = arith.constant 0 : i32
    %c0_i32_0 = arith.constant 0 : i32
    %c0_i32_1 = arith.constant 0 : i32
    return %c0_i32, %c0_i32_0 : i32, i32
  }
  func.func @transform_5(%arg0: i32) -> (i32, i32) {
    %c0_i32 = arith.constant 0 : i32
    %c0_i32_0 = arith.constant 0 : i32
    return %c0_i32, %arg0 : i32, i32
  }
}

</mosaic_0001>

<bundles_post_ra>
// kernel: tpu_custom_call.1
= control target key start
LH: loop header
LB: loop body
LE: loop exit
PB: predicated region body
PF: predicated region fallthrough
CT: control target
= control target key end

     0   :  { %s1217_s0 = inlined_call_operand.hbm [shape: f32[8,32], index: 0, kind: input, shape index: {}]   ;;  %s1218_s1 = inlined_call_operand.hbm [shape: f32[32,32], index: 1, kind: input, shape index: {}]   ;;  %s1219_s2 = inlined_call_operand.vmem [shape: f32[1,32], index: 2, kind: input, shape index: {}]   ;;  %s1220_s3 = inlined_call_operand.vmem [shape: f32[1,16], index: 3, kind: input, shape index: {}]   ;;  %s1221_s4 = inlined_call_operand.<no memory space> [shape: f32[1,1], index: 4, kind: input, shape index: {}]   ;;  %s1222_s5 = inlined_call_operand.hbm [shape: f32[1,8], index: 5, kind: output, shape index: {}]  }
   0x1   :  { %v10_v0 = vstv %s1221_s4 }
   0x2   :  { %11 = vst [vmem:[#allocation2] sm:$0x1] %v10_v0 }
   0x3   :  { %12 = vsyncpa [#allocation4], 0 }
   0x4   :  { %13 = vsyncpa [#allocation7], 0 }
   0x5   :  { %14 = vsyncpa [#allocation5], 0 }
   0x6   :  { %19 = vsyncadd [#allocation4], 1920  ;;  %s987_s20 = smov [#allocation3]   ;;  %s915_s24 = scalar_lea.hbm %s1217_s0, 128 }
   0x7   :  { %s20_s21 = sshll.u32 %s987_s20, 4  ;;  %p916_p0 = scmp.ne.s32.totalorder %s1217_s0, %s915_s24  ;;  %s21_s21 = int_to_ptr.vmem [resolvable:$true] %s20_s21 }
   0x8   :  { %p919_p1 = scmp.lt.u32.totalorder %s915_s24, %s1217_s0 }
   0xa   :  { %p921_p2 = pnand %p919_p1, %p916_p0 }
   0xc   :  { %924 = shalt.err (!%p921_p2)
}
   0xd   :  { %s925_s4 = scalar_lea.vmem %s21_s21, 128  ;;  %s929_s29 = scalar_lea.vmem %s21_s21, 2048 }
   0xe   :  { %p926_p3 = scmp.ne.s32.totalorder %s21_s21, %s925_s4  ;;  %p930_p4 = scmp.lt.s32.totalorder %s21_s21, %s21_s21 }
   0xf   :  { %p931_p5 = scmp.lt.s32.totalorder %s929_s29, %s925_s4 }
  0x11   :  { %p932_p6 = por %p931_p5, %p930_p4 }
  0x13   :  { %p933_p7 = pnand %p932_p6, %p926_p3 }
  0x15   :  { %936 = shalt.err (!%p933_p7)
}
  0x16   :  { %s988_s30 = smov 128   ;;  %s989_s6 = smov 8  }
  0x17   :  { %26 = dma.hbm_to_vmem [thread:$0]  %s1217_s0, 128, %s21_s21, [#allocation4], %s988_s30, %s988_s30, %s989_s6  }
  0x18   :  { %s990_s9 = smov [#allocation6]   ;;  %s937_s13 = scalar_lea.hbm %s1218_s1, 512 }
  0x19   :  { %s32_s10 = sshll.u32 %s990_s9, 4  ;;  %p938_p8 = scmp.ne.s32.totalorder %s1218_s1, %s937_s13  ;;  %s33_s10 = int_to_ptr.vmem [resolvable:$true] %s32_s10 }
  0x1a   :  { %p941_p9 = scmp.lt.u32.totalorder %s937_s13, %s1218_s1 }
  0x1c   :  { %p943_p10 = pnand %p941_p9, %p938_p8 }
  0x1e   :  { %946 = shalt.err (!%p943_p10)
}
  0x1f   :  { %s947_s18 = scalar_lea.vmem %s33_s10, 512  ;;  %p952_p12 = scmp.lt.s32.totalorder %s33_s10, %s33_s10 }
  0x20   :  { %p948_p11 = scmp.ne.s32.totalorder %s33_s10, %s947_s18  ;;  %p953_p13 = scmp.lt.s32.totalorder %s947_s18, %s947_s18 }
  0x22   :  { %p954_p0 = por %p953_p13, %p952_p12 }
  0x24   :  { %p955_p1 = pnand %p954_p0, %p948_p11 }
  0x26   :  { %958 = shalt.err (!%p955_p1)
}
  0x27   :  { %38 = dma.hbm_to_vmem [thread:$0]  %s1218_s1, 512, %s33_s10, [#allocation7], %s988_s30, %s988_s30, %s989_s6  }
  0x28   :  { %981 = dma.done.wait [#allocation4], 2048  }
  0x29   :  { %982 = vsyncadd [#allocation4], 4294965248 }
  0x2a   :  { %983 = dma.done.wait [#allocation7], 512  }
  0x2b   :  { %984 = vsyncadd [#allocation7], 4294966784  ;;  %vm78_vm0 = vcmask 261120   ;;  %v67_v1 = vld [vmem:[#allocation6] sm:$0xff]  ;;  %v68_v2 = vld [vmem:[#allocation6 + $0x8] sm:$0xff]  ;;  %vm993_vm1 = vmmov 0  }
  0x2c   :  { %v69_v3 = vld [vmem:[#allocation6 + $0x10] sm:$0xff]  ;;  %v768_v4 = vpack.c.bf16 %v68_v2, %v67_v1  ;;  %v70_v5 = vld [vmem:[#allocation6 + $0x18] sm:$0xff]  ;;  %v51_v6 = vld [vmem:[#allocation3] sm:$0xff]  ;;  %vm475_vm2 = vcmask 130048   ;;  %s996_s23 = smov [#allocation8]  }
  0x2d   :  { %v772_v7 = vpack.c.bf16 %v70_v5, %v69_v3  ;;  %709 = vmatprep.mubr.msk.f32.mxu0 %vm78_vm0, %v51_v6  ;;  %v52_v8 = vld [vmem:[#allocation3 + $0x8] sm:$0xff]  ;;  %v53_v9 = vld [vmem:[#allocation3 + $0x10] sm:$0xff]  ;;  %v54_v10 = vld [vmem:[#allocation3 + $0x18] sm:$0xff]  ;;  %s604_s24 = sshll.u32 %s996_s23, 4  ;;  %s605_s24 = int_to_ptr.vmem [resolvable:$true] %s604_s24 }
  0x2e   :  { %769 = vmatprep.subr.bf16.mxu0 %v768_v4  ;;  %v55_v11 = vld [vmem:[#allocation3 + $0x20] sm:$0xff]  ;;  %v56_v12 = vld [vmem:[#allocation3 + $0x28] sm:$0xff]  ;;  %v57_v13 = vld [vmem:[#allocation3 + $0x30] sm:$0xff]  ;;  %s959_s25 = scalar_lea.vmem %s605_s24, 16  ;;  %s963_s26 = scalar_lea.vmem %s605_s24, 32 }
  0x2f   :  { %771 = vmatpush3.bf16.msra.mxu0 %v768_v4  ;;  %v58_v14 = vld [vmem:[#allocation3 + $0x38] sm:$0xff]  ;;  %v59_v15 = vld [vmem:[#allocation3 + $0x40] sm:$0xff]  ;;  %v60_v16 = vld [vmem:[#allocation3 + $0x48] sm:$0xff]  ;;  %v991_v4 = vmov 0.0|0.0   ;;  %p960_p2 = scmp.ne.s32.totalorder %s605_s24, %s959_s25  ;;  %p964_p3 = scmp.lt.s32.totalorder %s605_s24, %s605_s24 }
  0x30   :  { %773 = vmatprep.subr.bf16.mxu0 %v772_v7  ;;  %v61_v17 = vld [vmem:[#allocation3 + $0x50] sm:$0xff]  ;;  %v62_v18 = vld [vmem:[#allocation3 + $0x58] sm:$0xff]  ;;  %v63_v19 = vld [vmem:[#allocation3 + $0x60] sm:$0xff]  ;;  %776 = vmatprep.subr.bf16.mxu1 %v991_v4  ;;  %p965_p4 = scmp.lt.s32.totalorder %s963_s26, %s959_s25 }
  0x31   :  { %v64_v20 = vld [vmem:[#allocation3 + $0x68] sm:$0xff]  ;;  %v65_v21 = vld [vmem:[#allocation3 + $0x70] sm:$0xff]  ;;  %v66_v22 = vld [vmem:[#allocation3 + $0x78] sm:$0xff] }
  0x32   :  { %v1073_v23 = vld [vmem:[%s1219_s2] ss:$0 sm:$0xff]  ;;  %s992_s2 = smov 112   ;;  %vm1166_vm3 = vmpackc.low %vm475_vm2, %vm475_vm2  ;;  %p966_p5 = por %p965_p4, %p964_p3 }
  0x33   :  { %775 = vmatpush3.bf16.msra.mxu0 %v772_v7 }
  0x34   :  { %p967_p6 = pnand %p966_p5, %p960_p2 }
  0x36   :  { %710 = vmatmul.mubr.msk.f32.vlgmr.msra.gmra.mrb[0].mxu0 %vm78_vm0, %v52_v8 }
  0x37   :  { %712 = vmatprep.mubr.msk.f32.mxu0 %vm78_vm0, %v53_v9 }
  0x3a   :  { %713 = vmatmul.mubr.msk.f32.gmra.mrb[2].mxu0 %vm78_vm0, %v54_v10 }
  0x3b   :  { %715 = vmatprep.mubr.msk.f32.mxu0 %vm78_vm0, %v55_v11 }
  0x3e   :  { %716 = vmatmul.mubr.msk.f32.gmra.mrb[4].mxu0 %vm78_vm0, %v56_v12 }
  0x3f   :  { %718 = vmatprep.mubr.msk.f32.mxu0 %vm78_vm0, %v57_v13 }
  0x42   :  { %719 = vmatmul.mubr.msk.f32.gmra.mrb[6].mxu0 %vm78_vm0, %v58_v14 }
  0x43   :  { %721 = vmatprep.mubr.msk.f32.mxu0 %vm78_vm0, %v59_v15 }
  0x46   :  { %722 = vmatmul.mubr.msk.f32.gmra.mrb[8].mxu0 %vm78_vm0, %v60_v16 }
  0x47   :  { %724 = vmatprep.mubr.msk.f32.mxu0 %vm78_vm0, %v61_v17 }
  0x4a   :  { %725 = vmatmul.mubr.msk.f32.gmra.mrb[10].mxu0 %vm78_vm0, %v62_v18 }
  0x4b   :  { %727 = vmatprep.mubr.msk.f32.mxu0 %vm78_vm0, %v63_v19 }
  0x4e   :  { %728 = vmatmul.mubr.msk.f32.gmra.mrb[12].mxu0 %vm78_vm0, %v64_v20 }
  0x4f   :  { %730 = vmatprep.mubr.msk.f32.mxu0 %vm78_vm0, %v65_v21 }
  0x52   :  { %731 = vmatmul.mubr.msk.f32.gmra.mrb[14].mxu0 %vm78_vm0, %v66_v22 }
 0x109   :  { %v711_v24 = vpop.f32.mrb[0].mxu0 }
 0x10a   :  { %v1076_v25 = vadd.f32 %v711_v24, %v1073_v23  ;;  %v193_v26 = vpop.f32.mrb[1].mxu0 }
 0x10b   :  { %v1079_v27 = vadd.f32 %v1073_v23, %v193_v26 }
 0x10c   :  { %v632_v28 = vmul.f32 -1.442695, %v1076_v25 }
 0x10d   :  { %v631_v29 = vmul.f32 -1.442695, %v1079_v27  ;;  %v714_v30 = vpop.f32.mrb[2].mxu0 }
 0x10e   :  { %819 = vpow2.f32 %v632_v28  ;;  %v1084_v31 = vadd.f32 %v714_v30, %v1073_v23  ;;  %v203_v32 = vpop.f32.mrb[3].mxu0 }
 0x10f   :  { %821 = vpow2.f32 %v631_v29  ;;  %v1087_v33 = vadd.f32 %v1073_v23, %v203_v32 }
 0x110   :  { %v634_v34 = vmul.f32 -1.442695, %v1084_v31 }
 0x111   :  { %v633_v35 = vmul.f32 -1.442695, %v1087_v33  ;;  %v717_v36 = vpop.f32.mrb[4].mxu0 }
 0x112   :  { %823 = vpow2.f32 %v634_v34  ;;  %v1092_v37 = vadd.f32 %v717_v36, %v1073_v23  ;;  %v213_v38 = vpop.f32.mrb[5].mxu0 }
 0x113   :  { %825 = vpow2.f32 %v633_v35  ;;  %v1095_v39 = vadd.f32 %v1073_v23, %v213_v38 }
 0x114   :  { %v636_v40 = vmul.f32 -1.442695, %v1092_v37 }
 0x115   :  { %v635_v41 = vmul.f32 -1.442695, %v1095_v39  ;;  %v720_v42 = vpop.f32.mrb[6].mxu0 }
 0x116   :  { %827 = vpow2.f32 %v636_v40  ;;  %v1100_v43 = vadd.f32 %v720_v42, %v1073_v23  ;;  %v223_v44 = vpop.f32.mrb[7].mxu0 }
 0x117   :  { %829 = vpow2.f32 %v635_v41  ;;  %v1103_v45 = vadd.f32 %v1073_v23, %v223_v44 }
 0x118   :  { %v820_v46 = vpop.eup %819  ;;  %v638_v47 = vmul.f32 -1.442695, %v1100_v43 }
 0x119   :  { %v822_v48 = vpop.eup %821  ;;  %v637_v49 = vmul.f32 -1.442695, %v1103_v45  ;;  %v723_v50 = vpop.f32.mrb[8].mxu0  ;;  %v337_v54 = vadd.f32 1.0, %v820_v46 }
 0x11a   :  { %v336_v51 = vadd.f32 1.0, %v822_v48  ;;  %831 = vpow2.f32 %v638_v47  ;;  %v1108_v52 = vadd.f32 %v723_v50, %v1073_v23  ;;  %v233_v53 = vpop.f32.mrb[9].mxu0 }
 0x11b   :  { %v1112_v58 = vadd.f32 %v1073_v23, %v233_v53 }
 0x11c   :  { %v824_v55 = vpop.eup %823  ;;  %833 = vrcp.f32 %v336_v51  ;;  %v640_v57 = vmul.f32 -1.442695, %v1108_v52 }
 0x11d   :  { %v826_v56 = vpop.eup %825  ;;  %835 = vpow2.f32 %v637_v49  ;;  %v726_v59 = vpop.f32.mrb[10].mxu0  ;;  %v339_v60 = vadd.f32 1.0, %v824_v55  ;;  %v639_v2 = vmul.f32 -1.442695, %v1112_v58 }
 0x11e   :  { %v338_v61 = vadd.f32 1.0, %v826_v56  ;;  %v243_v62 = vpop.f32.mrb[11].mxu0  ;;  %837 = vrcp.f32 %v337_v54  ;;  %v1115_v0 = vadd.f32 %v726_v59, %v1073_v23 }
 0x11f   :  { %v1120_v8 = vadd.f32 %v1073_v23, %v243_v62 }
 0x120   :  { %v828_v63 = vpop.eup %827  ;;  %839 = vrcp.f32 %v338_v61  ;;  %v642_v10 = vmul.f32 -1.442695, %v1115_v0 }
 0x121   :  { %v830_v1 = vpop.eup %829  ;;  %841 = vpow2.f32 %v640_v57  ;;  %v729_v3 = vpop.f32.mrb[12].mxu0  ;;  %v341_v5 = vadd.f32 1.0, %v828_v63  ;;  %v641_v17 = vmul.f32 -1.442695, %v1120_v8 }
 0x122   :  { %843 = vrcp.f32 %v339_v60  ;;  %v340_v6 = vadd.f32 1.0, %v830_v1  ;;  %v253_v7 = vpop.f32.mrb[13].mxu0  ;;  %v1124_v12 = vadd.f32 %v729_v3, %v1073_v23 }
 0x123   :  { %v1129_v19 = vadd.f32 %v1073_v23, %v253_v7  ;;  %v995_v7 = vmov 0  }
 0x124   :  { %v832_v9 = vpop.eup %831  ;;  %845 = vrcp.f32 %v340_v6  ;;  %v644_v21 = vmul.f32 -1.442695, %v1124_v12  ;;  %v465_v6 = vld [vmem:[#allocation2] sm:$0x1]  ;;  %818 = vset.pattern.permute.xlu0 %v995_v7 }
 0x125   :  { %v343_v11 = vadd.f32 1.0, %v832_v9  ;;  %847 = vpow2.f32 %v639_v2  ;;  %v732_v13 = vpop.f32.mrb[14].mxu0  ;;  %v643_v30 = vmul.f32 -1.442695, %v1129_v19 }
 0x126   :  { %v834_v14 = vpop.eup %833  ;;  %849 = vrcp.f32 %v341_v5  ;;  %v263_v15 = vpop.f32.mrb[15].mxu0  ;;  %v1133_v26 = vadd.f32 %v732_v13, %v1073_v23  ;;  %v994_v5 = vmov 0.0  }
 0x127   :  { %v836_v16 = vpop.eup %835  ;;  %400 = vrot.lane.b32.xlu0 %v834_v14, %s992_s2  ;;  %851 = vpow2.f32 %v642_v10  ;;  %v1139_v34 = vadd.f32 %v1073_v23, %v263_v15  ;;  %765 = vmatprep.mubr.msk.f32.mxu1 %vm993_vm1, %v994_v5 }
 0x128   :  { %v342_v18 = vadd.f32 1.0, %v836_v16  ;;  %v838_v20 = vpop.eup %837  ;;  %853 = vrcp.f32 %v343_v11  ;;  %v646_v36 = vmul.f32 -1.442695, %v1133_v26 }
 0x129   :  { %v645_v42 = vmul.f32 -1.442695, %v1139_v34 }
 0x12a   :  { %v840_v22 = vpop.eup %839  ;;  %855 = vrcp.f32 %v342_v18 }
 0x12b   :  { %v842_v24 = vpop.eup %841  ;;  %857 = vpow2.f32 %v641_v17  ;;  %404 = vrot.lane.b32.xlu1 %v840_v22, %s992_s2  ;;  %402 = vrot.lane.b32.xlu0 %v838_v20, %s992_s2 }
 0x12c   :  { %v844_v28 = vpop.eup %843  ;;  %v345_v29 = vadd.f32 1.0, %v842_v24  ;;  %859 = vpow2.f32 %v644_v21 }
 0x12e   :  { %v846_v32 = vpop.eup %845  ;;  %861 = vrcp.f32 %v345_v29 }
 0x12f   :  { %v848_v35 = vpop.eup %847  ;;  %406 = vrot.lane.b32.xlu1 %v844_v28, %s992_s2  ;;  %408 = vrot.lane.b32.xlu0 %v846_v32, %s992_s2  ;;  %863 = vpow2.f32 %v643_v30 }
 0x130   :  { %v850_v38 = vpop.eup %849  ;;  %v344_v40 = vadd.f32 1.0, %v848_v35 }
 0x131   :  { %v852_v41 = vpop.eup %851 }
 0x132   :  { %865 = vrcp.f32 %v344_v40  ;;  %v854_v44 = vpop.eup %853  ;;  %v347_v46 = vadd.f32 1.0, %v852_v41 }
 0x133   :  { %867 = vpow2.f32 %v646_v36  ;;  %410 = vrot.lane.b32.xlu1 %v850_v38, %s992_s2 }
 0x134   :  { %v856_v23 = vpop.eup %855  ;;  %869 = vrcp.f32 %v347_v46 }
 0x135   :  { %v858_v47 = vpop.eup %857  ;;  %412 = vrot.lane.b32.xlu0 %v856_v23, %s992_s2  ;;  %871 = vpow2.f32 %v645_v42 }
 0x136   :  { %v346_v48 = vadd.f32 1.0, %v858_v47  ;;  %v860_v49 = vpop.eup %859 }
 0x137   :  { %414 = vrot.lane.b32.xlu1 %v854_v44, %s992_s2  ;;  %v349_v51 = vadd.f32 1.0, %v860_v49 }
 0x138   :  { %v862_v50 = vpop.eup %861  ;;  %873 = vrcp.f32 %v346_v48 }
 0x139   :  { %v864_v53 = vpop.eup %863  ;;  %875 = vrcp.f32 %v349_v51 }
 0x13a   :  { %v348_v54 = vadd.f32 1.0, %v864_v53 }
 0x13b   :  { %418 = vrot.lane.b32.xlu1 %v862_v50, %s992_s2 }
 0x13c   :  { %v866_v55 = vpop.eup %865  ;;  %877 = vrcp.f32 %v348_v54 }
 0x13d   :  { %v868_v56 = vpop.eup %867  ;;  %416 = vrot.lane.b32.xlu0 %v866_v55, %s992_s2 }
 0x13e   :  { %v351_v57 = vadd.f32 1.0, %v868_v56  ;;  %v870_v59 = vpop.eup %869 }
 0x13f   :  { %v872_v60 = vpop.eup %871  ;;  %422 = vrot.lane.b32.xlu1 %v870_v59, %s992_s2 }
 0x140   :  { %879 = vrcp.f32 %v351_v57  ;;  %v350_v61 = vadd.f32 1.0, %v872_v60 }
 0x142   :  { %v874_v62 = vpop.eup %873  ;;  %881 = vrcp.f32 %v350_v61 }
 0x143   :  { %420 = vrot.lane.b32.xlu0 %v874_v62, %s992_s2  ;;  %v876_v63 = vpop.eup %875  ;;  %883 = vtanh.f32 %v1076_v25 }
 0x144   :  { %426 = vrot.lane.b32.xlu1 %v876_v63, %s992_s2  ;;  %885 = vtanh.f32 %v1079_v27 }
 0x145   :  { %887 = vtanh.f32 %v1084_v31 }
 0x146   :  { %v878_v1 = vpop.eup %877  ;;  %889 = vtanh.f32 %v1087_v33 }
 0x147   :  { %424 = vrot.lane.b32.xlu0 %v878_v1, %s992_s2  ;;  %891 = vtanh.f32 %v1092_v37  ;;  %v464_v1 = vld [vmem:[%s1220_s3] sm:$0x1] }
 0x148   :  { %893 = vtanh.f32 %v1095_v39 }
 0x149   :  { %895 = vtanh.f32 %v1100_v43 }
 0x14a   :  { %v880_v2 = vpop.eup %879  ;;  %897 = vtanh.f32 %v1103_v45 }
 0x14b   :  { %430 = vrot.lane.b32.xlu1 %v880_v2, %s992_s2  ;;  %899 = vtanh.f32 %v1108_v52  ;;  %v471_v2 = vlaneseq }
 0x14c   :  { %v882_v3 = vpop.eup %881  ;;  %901 = vtanh.f32 %v1112_v58 }
 0x14d   :  { %428 = vrot.lane.b32.xlu0 %v882_v3, %s992_s2  ;;  %v884_v10 = vpop.eup %883  ;;  %903 = vtanh.f32 %v1115_v0  ;;  %v472_v3 = vshrl.u32 %v471_v2, 7 }
 0x14e   :  { %v886_v11 = vpop.eup %885  ;;  %905 = vtanh.f32 %v1120_v8 }
 0x14f   :  { %v888_v31 = vpop.eup %887  ;;  %907 = vtanh.f32 %v1124_v12  ;;  %v473_v5 = vsub.s32 0, %v472_v3 }
 0x150   :  { %v890_v37 = vpop.eup %889  ;;  %909 = vtanh.f32 %v1129_v19 }
 0x151   :  { %468 = vperm.xlu0 %818, %v465_v6   ;;  %v892_v43 = vpop.eup %891  ;;  %911 = vtanh.f32 %v1133_v26 }
 0x152   :  { %v894_v20 = vpop.eup %893  ;;  %913 = vtanh.f32 %v1139_v34 }
 0x153   :  { %v896_v29 = vpop.eup %895 }
 0x154   :  { %v898_v32 = vpop.eup %897 }
 0x155   :  { %v900_v58 = vpop.eup %899 }
 0x156   :  { %v902_v42 = vpop.eup %901 }
 0x157   :  { %v904_v47 = vpop.eup %903 }
 0x158   :  { %v906_v48 = vpop.eup %905 }
 0x159   :  { %v908_v51 = vpop.eup %907 }
 0x15a   :  { %v910_v54 = vpop.eup %909 }
 0x15b   :  { %v912_v59 = vpop.eup %911 }
 0x15c   :  { %v914_v61 = vpop.eup %913 }
 0x199   :  { %v401_v9 = vpop.permute.xlu0 %400 }
 0x19a   :  { %v448_v15 = vmul.f32 %v886_v11, %v401_v9 }
 0x19d   :  { %v405_v13 = vpop.permute.xlu1 %404  ;;  %v403_v14 = vpop.permute.xlu0 %402 }
 0x19e   :  { %v449_v25 = vmul.f32 %v884_v10, %v403_v14  ;;  %v450_v17 = vmul.f32 %v890_v37, %v405_v13 }
 0x1a0   :  { %v777_v33 = vpack.c.bf16 %v449_v25, %v448_v15 }
 0x1a1   :  { %v407_v39 = vpop.permute.xlu1 %406  ;;  %v409_v16 = vpop.permute.xlu0 %408 }
 0x1a2   :  { %v451_v18 = vmul.f32 %v888_v31, %v407_v39  ;;  %779 = vmatpush3.bf16.xpose.msk.msra.mxu1 %vm1166_vm3, %v777_v33  ;;  %v452_v22 = vmul.f32 %v894_v20, %v409_v16 }
 0x1a3   :  { %780 = vmatprep.subr.bf16.mxu1 %v991_v4 }
 0x1a4   :  { %v781_v45 = vpack.c.bf16 %v451_v18, %v450_v17 }
 0x1a5   :  { %v411_v21 = vpop.permute.xlu1 %410 }
 0x1a6   :  { %v453_v24 = vmul.f32 %v892_v43, %v411_v21 }
 0x1a7   :  { %v413_v28 = vpop.permute.xlu0 %412 }
 0x1a8   :  { %v785_v30 = vpack.c.bf16 %v453_v24, %v452_v22  ;;  %v454_v36 = vmul.f32 %v898_v32, %v413_v28 }
 0x1a9   :  { %v415_v35 = vpop.permute.xlu1 %414 }
 0x1aa   :  { %v455_v38 = vmul.f32 %v896_v29, %v415_v35  ;;  %783 = vmatpush3.bf16.xpose.msk.msra.mxu1 %vm1166_vm3, %v781_v45 }
 0x1ab   :  { %784 = vmatprep.subr.bf16.mxu1 %v991_v4 }
 0x1ac   :  { %v789_v52 = vpack.c.bf16 %v455_v38, %v454_v36 }
 0x1ad   :  { %v419_v40 = vpop.permute.xlu1 %418 }
 0x1ae   :  { %v457_v41 = vmul.f32 %v900_v58, %v419_v40 }
 0x1af   :  { %v417_v44 = vpop.permute.xlu0 %416 }
 0x1b0   :  { %v456_v0 = vmul.f32 %v902_v42, %v417_v44 }
 0x1b1   :  { %v423_v23 = vpop.permute.xlu1 %422 }
 0x1b2   :  { %v793_v46 = vpack.c.bf16 %v457_v41, %v456_v0  ;;  %787 = vmatpush3.bf16.xpose.msk.msra.mxu1 %vm1166_vm3, %v785_v30  ;;  %v459_v8 = vmul.f32 %v904_v47, %v423_v23 }
 0x1b3   :  { %788 = vmatprep.subr.bf16.mxu1 %v991_v4 }
 0x1b5   :  { %v421_v49 = vpop.permute.xlu0 %420 }
 0x1b6   :  { %v458_v12 = vmul.f32 %v906_v48, %v421_v49  ;;  %v427_v50 = vpop.permute.xlu1 %426 }
 0x1b7   :  { %v461_v53 = vmul.f32 %v908_v51, %v427_v50 }
 0x1b8   :  { %v797_v19 = vpack.c.bf16 %v459_v8, %v458_v12 }
 0x1b9   :  { %v425_v55 = vpop.permute.xlu0 %424 }
 0x1ba   :  { %791 = vmatpush3.bf16.xpose.msk.msra.mxu1 %vm1166_vm3, %v789_v52  ;;  %v460_v56 = vmul.f32 %v910_v54, %v425_v55 }
 0x1bb   :  { %792 = vmatprep.subr.bf16.mxu1 %v991_v4 }
 0x1bc   :  { %v801_v57 = vpack.c.bf16 %v461_v53, %v460_v56 }
 0x1bd   :  { %v431_v26 = vpop.permute.xlu1 %430 }
 0x1be   :  { %v463_v60 = vmul.f32 %v912_v59, %v431_v26 }
 0x1bf   :  { %v429_v62 = vpop.permute.xlu0 %428 }
 0x1c0   :  { %v462_v34 = vmul.f32 %v914_v61, %v429_v62 }
 0x1c2   :  { %795 = vmatpush3.bf16.xpose.msk.msra.mxu1 %vm1166_vm3, %v793_v46  ;;  %v805_v63 = vpack.c.bf16 %v463_v60, %v462_v34 }
 0x1c3   :  { %796 = vmatprep.subr.bf16.mxu1 %v991_v4 }
 0x1ca   :  { %799 = vmatpush3.bf16.xpose.msk.msra.mxu1 %vm1166_vm3, %v797_v19 }
 0x1cb   :  { %800 = vmatprep.subr.bf16.mxu1 %v991_v4 }
 0x1d0   :  { %v469_v6 = vpop.permute.xlu0 %468 }
 0x1d1   :  { %v474_v7 = vrot.slane %v469_v6, %v473_v5 }
 0x1d2   :  { %803 = vmatpush3.bf16.xpose.msk.msra.mxu1 %vm1166_vm3, %v801_v57 }
 0x1d3   :  { %804 = vmatprep.subr.bf16.mxu1 %v991_v4 }
 0x1da   :  { %807 = vmatpush3.bf16.xpose.msk.msra.mxu1 %vm1166_vm3, %v805_v63 }
 0x1e1   :  { %766 = vmatmul.mubr.msk.f32.vlgmr.msra.gmra.mrb[0].mxu1 %vm475_vm2, %v464_v1 }
 0x2b4   :  { %v593_v9 = vpop.f32.mrb[0].mxu1 }
 0x2b5   :  { %v594_v10 = vadd.f32 %v593_v9, %v474_v7  ;;  %v767_v11 = vpop.f32.mrb[1].mxu1 }
 0x2b7   :  { %597 = vst [vmem:[#allocation8] sm:$0x1] %v594_v10 }
 0x2b8   :  { %970 = shalt.err (!%p967_p6)
}
 0x2b9   :  { %s971_s28 = scalar_lea.hbm %s1222_s5, 16 }
 0x2ba   :  { %p972_p7 = scmp.ne.s32.totalorder %s1222_s5, %s971_s28  ;;  %p975_p8 = scmp.lt.u32.totalorder %s971_s28, %s1222_s5 }
 0x2bc   :  { %p977_p9 = pnand %p975_p8, %p972_p7 }
 0x2be   :  { %980 = shalt.err (!%p977_p9)
}
 0x2bf   :  { %607 = dma.vmem_to_hbm [thread:$0]  %s605_s24, 16, %s1222_s5, [#allocation5]  }
 0x2c0   :  { %985 = dma.done.wait [#allocation5], 16  }
 0x2c1   :  { %986 = vsyncadd [#allocation5], 4294967280 }
 0x2c2   :  { %611 = vsyncpa [#allocation4], 1 }
 0x2c3   :  { %612 = vsyncpa [#allocation7], 1 }
 0x2c4   :  { %613 = vsyncpa [#allocation5], 1 }

</bundles_post_ra>
